<compile_context>
chip_gen: v7x
topology: tpu7x:2x2x1
jax: 0.10.0
libtpu: 0.0.40
codegen_flags: <defaults>
</compile_context>

<pallas_src>
import functools

import jax
import jax.numpy as jnp
from jax.experimental import pallas as pl
from jax.experimental.pallas import tpu as pltpu

PACKED_IN = 40      # 2 (loc) + 2 (status) + 30 (rays) + 6 (pad) -> multiple of 8
RAW_IN = 34         # 2 + 2 + 30
NOUT_PAD = 128      # lane-dense padded output width (>= output_dim)


def _round_up(n, m):
    return ((n + m - 1) // m) * m


# ----------------------------------------------------------------------------
# Pallas kernel: one batch tile of the whole ImprovedDQN forward pass.
# ----------------------------------------------------------------------------
def dqn_kernel(
    x_ref,                   # [TB, 40]   bf16 packed [loc|status|rays|pad]
    w1_ref, b1_ref,          # [40, 256]  bf16 fused stage-1, [1, 256] f32
    w_r2_ref, b_r2_ref,      # [128, 128] bf16 (real cols 64:128), [1, 128] f32
    w_c1_ref, b_c1_ref,      # [128, 256] bf16, [1, 256] f32
    w_c2_ref, b_c2_ref,      # [256, 256] bf16, [1, 256] f32
    w_c3_ref, b_c3_ref,      # [256, 128] bf16 (output padded), [1, 128] f32
    out_ref,                 # [TB, 128]  bf16
):
    cdt = jnp.bfloat16

    def mm(a, w_ref):
        return jnp.dot(a, w_ref[...], preferred_element_type=jnp.float32)

    x = x_ref[...]                                                  # bf16 [TB, 40]

    # Fused stage 1: one MXU push produces loc/status head AND ray layer 1.
    # cols 0:64 = relu(loc|status), 64:128 = exact zeros, 128:256 = ray hidden.
    s1 = jnp.maximum(mm(x, w1_ref) + b1_ref[...], 0.0)              # [TB, 256] f32
    ls = s1[:, :128]                                 # [loc|status|0...]  (vreg-aligned)
    rh = s1[:, 128:]                                 # ray hidden          (vreg-aligned)

    # ray_net layer 2 written into lanes 64:128 (lanes 0:64 stay exact zeros).
    r = jnp.maximum(mm(rh.astype(cdt), w_r2_ref) + b_r2_ref[...], 0.0)   # [TB, 128]

    # 128-wide [loc|status|rays] activation via a plain VPU add (no lane concat).
    comb = (ls + r).astype(cdt)                                     # [TB, 128] bf16

    # combined_net
    h = jnp.maximum(mm(comb, w_c1_ref) + b_c1_ref[...], 0.0)        # [TB, 256]
    h = jnp.maximum(mm(h.astype(cdt), w_c2_ref) + b_c2_ref[...], 0.0)
    # final layer padded to 128 output lanes -> unmasked lane-dense stores
    out_ref[...] = (mm(h.astype(cdt), w_c3_ref) + b_c3_ref[...]).astype(out_ref.dtype)


# ----------------------------------------------------------------------------
# Host-side parameter repacking into the kernel layout (done once).
# ----------------------------------------------------------------------------
def pack_params(params, output_dim):
    f32, bf16 = jnp.float32, jnp.bfloat16

    w_loc, b_loc = params["w_loc"], params["b_loc"]   # [2, 32],  [1, 32]
    w_st, b_st = params["w_st"], params["b_st"]       # [2, 32],  [1, 32]
    w_r1, b_r1 = params["w_r1"], params["b_r1"]       # [30,128], [1,128]
    w_r2, b_r2 = params["w_r2"], params["b_r2"]       # [128,64], [1, 64]
    w_c1, b_c1 = params["w_c1"], params["b_c1"]       # [128,256],[1,256]
    w_c2, b_c2 = params["w_c2"], params["b_c2"]       # [256,256],[1,256]
    w_c3, b_c3 = params["w_c3"], params["b_c3"]       # [256,out],[1,out]

    # Fused stage-1 weight over the packed input
    # (cols 0:2 loc, 2:4 status, 4:34 rays of the packed x).
    w1 = jnp.zeros((PACKED_IN, 256), f32)
    w1 = w1.at[0:2, 0:32].set(w_loc)
    w1 = w1.at[2:4, 32:64].set(w_st)
    w1 = w1.at[4:34, 128:256].set(w_r1)
    b1 = jnp.zeros((1, 256), f32)
    b1 = b1.at[:, 0:32].set(b_loc).at[:, 32:64].set(b_st).at[:, 128:256].set(b_r1)

    # ray layer 2 padded to 128 output lanes, real columns in 64:128 so the
    # [loc|status|rays] activation is formed by a VPU add.
    w_r2p = jnp.zeros((128, 128), f32).at[:, 64:128].set(w_r2)
    b_r2p = jnp.zeros((1, 128), f32).at[:, 64:128].set(b_r2)

    # Pad the final layer to a lane-dense output width.
    nout = max(NOUT_PAD, _round_up(output_dim, 128))
    w_c3p = jnp.zeros((256, nout), f32).at[:, :output_dim].set(w_c3)
    b_c3p = jnp.zeros((1, nout), f32).at[:, :output_dim].set(b_c3)

    return dict(
        w1=w1.astype(bf16), b1=b1.astype(f32),
        w_r2=w_r2p.astype(bf16), b_r2=b_r2p.astype(f32),
        w_c1=w_c1.astype(bf16), b_c1=b_c1.astype(f32),
        w_c2=w_c2.astype(bf16), b_c2=b_c2.astype(f32),
        w_c3=w_c3p.astype(bf16), b_c3=b_c3p.astype(f32),
    )


# ----------------------------------------------------------------------------
# Activation packing: do this ONCE where the state is built (not per call).
# ----------------------------------------------------------------------------
def pack_state(state):
    loc = state["location"].astype(jnp.float32)
    status = state["status"].astype(jnp.float32)
    rays = state["rays"].astype(jnp.float32)
    B = loc.shape[0]
    return jnp.concatenate(
        [loc, status, rays, jnp.zeros((B, PACKED_IN - RAW_IN), jnp.float32)], axis=1
    ).astype(jnp.bfloat16)                            # [B, 40] bf16


# ----------------------------------------------------------------------------
# Wrapper: tile the batch, call the kernel, slice the real output (fuses under jit).
# ----------------------------------------------------------------------------
def improved_dqn_forward(x_packed, kparams, output_dim, *, tile_b=2048):
    B = x_packed.shape[0]
    nout = kparams["w_c3"].shape[1]

    # Batch tile: cap at tile_b, and also at ceil(B/2) rounded up to 8 sublanes
    # so the "parallel" grid has >= 2 steps -> both v7x TensorCores get work.
    half = _round_up(max(-(-B // 2), 1), 8)
    tb = max(8, min(tile_b, half))
    bp = _round_up(max(B, 1), tb)
    if bp != B:
        x_packed = jnp.pad(x_packed, ((0, bp - B), (0, 0)))
    nb = bp // tb

    def const_spec(arr):
        # Whole-array weight/bias block with a constant block index: fetched
        # once, VMEM-resident across the whole grid (no multi-buffering needed).
        return pl.BlockSpec(arr.shape, lambda i: (0, 0))

    w_args = [
        kparams["w1"], kparams["b1"],
        kparams["w_r2"], kparams["b_r2"],
        kparams["w_c1"], kparams["b_c1"],
        kparams["w_c2"], kparams["b_c2"],
        kparams["w_c3"], kparams["b_c3"],
    ]

    flops = 2 * bp * (
        PACKED_IN * 256      # fused stage 1
        + 128 * 128          # ray layer 2 (padded)
        + 128 * 256          # combined layer 1
        + 256 * 256          # combined layer 2
        + 256 * nout         # padded output layer
    )
    bytes_accessed = (
        x_packed.size * x_packed.dtype.itemsize
        + sum(a.size * a.dtype.itemsize for a in w_args)
        + bp * nout * 2      # bf16 output
    )

    out = pl.pallas_call(
        dqn_kernel,
        out_shape=jax.ShapeDtypeStruct((bp, nout), jnp.bfloat16),
        grid=(nb,),
        in_specs=[pl.BlockSpec((tb, PACKED_IN), lambda i: (i, 0))]
        + [const_spec(a) for a in w_args],
        out_specs=pl.BlockSpec((tb, nout), lambda i: (i, 0)),
        compiler_params=pltpu.CompilerParams(
            dimension_semantics=("parallel",),
            vmem_limit_bytes=32 * 1024 * 1024,   # explicit: covers v5e's 16 MiB default
        ),
        cost_estimate=pl.CostEstimate(
            flops=flops, bytes_accessed=bytes_accessed, transcendentals=0
        ),
    )(x_packed, *w_args)

    # Slice off pad rows / pad lanes; under jit this fuses with the consumer.
    return out[:B, :output_dim].astype(jnp.float32)


# ----------------------------------------------------------------------------
# Deterministic parameter init matching the PyTorch module (xavier_uniform_
# weights, zero biases).  Weights are created directly in [in, out] layout;
# the xavier bound depends only on fan_in + fan_out so the distribution is
# identical to PyTorch's (out, in) layout.
# ----------------------------------------------------------------------------
def xavier_uniform(key, fan_in, fan_out):
    bound = jnp.sqrt(6.0 / (fan_in + fan_out))
    return jax.random.uniform(
        key, (fan_in, fan_out), dtype=jnp.float32, minval=-bound, maxval=bound
    )


def init_params(key, output_dim):
    dims = [
        ("loc", 2, 32),
        ("st", 2, 32),
        ("r1", 30, 128),
        ("r2", 128, 64),
        ("c1", 128, 256),
        ("c2", 256, 256),
        ("c3", 256, output_dim),
    ]
    keys = jax.random.split(key, len(dims))
    params = {}
    for k, (name, fi, fo) in zip(keys, dims):
        params[f"w_{name}"] = xavier_uniform(k, fi, fo)
        params[f"b_{name}"] = jnp.zeros((1, fo), dtype=jnp.float32)
    return params


# ----------------------------------------------------------------------------
# Pure-JAX reference mirroring the PyTorch forward (same bf16 matmul operands /
# f32 accumulation as the kernel, so the comparison is tight).
# ----------------------------------------------------------------------------
def reference_forward(state, params):
    bf16 = jnp.bfloat16

    def mm(x, w):
        return jnp.dot(x.astype(bf16), w.astype(bf16),
                       preferred_element_type=jnp.float32)

    def lin_relu(x, w, b):
        return jnp.maximum(mm(x, w) + b, 0.0)

    loc = lin_relu(state["location"], params["w_loc"], params["b_loc"])
    st = lin_relu(state["status"], params["w_st"], params["b_st"])
    r = lin_relu(state["rays"], params["w_r1"], params["b_r1"])
    r = lin_relu(r, params["w_r2"], params["b_r2"])
    comb = jnp.concatenate([loc, st, r], axis=-1)
    h = lin_relu(comb, params["w_c1"], params["b_c1"])
    h = lin_relu(h, params["w_c2"], params["b_c2"])
    return mm(h, params["w_c3"]) + params["b_c3"]


if __name__ == "__main__":
    B = 4
    OUTPUT_DIM = 8  # e.g. 8 discrete actions

    key = jax.random.PRNGKey(0)
    k_loc, k_st, k_rays, k_params = jax.random.split(key, 4)

    state = {
        "location": jax.random.normal(k_loc, (B, 2), dtype=jnp.float32),
        "status": jax.random.normal(k_st, (B, 2), dtype=jnp.float32),
        "rays": jax.random.normal(k_rays, (B, 30), dtype=jnp.float32),
    }
    params = init_params(k_params, OUTPUT_DIM)
    kparams = pack_params(params, OUTPUT_DIM)

    # Pack activations once, where the state is built (not per forward call).
    x = pack_state(state)

    fwd = jax.jit(functools.partial(improved_dqn_forward, output_dim=OUTPUT_DIM))
    out = jax.block_until_ready(fwd(x, kparams))

    ref = reference_forward(state, params)
    assert out.shape == (B, OUTPUT_DIM), out.shape
    # bf16 output store -> slightly looser tolerance than a pure-f32 path.
    assert jnp.allclose(out, ref, atol=2e-2, rtol=2e-2), float(
        jnp.max(jnp.abs(out - ref))
    )

    print("KERNEL_OK")
</pallas_src>

<mosaic_0001>
module attributes {stable_mosaic.version = 11 : i64} {
  func.func @dqn_kernel(%arg0: i32, %arg1: memref<8x40xbf16, #tpu.memory_space<vmem>>, %arg2: memref<40x256xbf16, #tpu.memory_space<vmem>>, %arg3: memref<1x256xf32, #tpu.memory_space<vmem>>, %arg4: memref<128x128xbf16, #tpu.memory_space<vmem>>, %arg5: memref<1x128xf32, #tpu.memory_space<vmem>>, %arg6: memref<128x256xbf16, #tpu.memory_space<vmem>>, %arg7: memref<1x256xf32, #tpu.memory_space<vmem>>, %arg8: memref<256x256xbf16, #tpu.memory_space<vmem>>, %arg9: memref<1x256xf32, #tpu.memory_space<vmem>>, %arg10: memref<256x128xbf16, #tpu.memory_space<vmem>>, %arg11: memref<1x128xf32, #tpu.memory_space<vmem>>, %arg12: memref<8x128xbf16, #tpu.memory_space<vmem>>) attributes {dimension_semantics = [#tpu.dimension_semantics<parallel>], iteration_bounds = array<i64: 1>, scalar_prefetch = 0 : i64, scratch_operands = 0 : i64, tpu.core_type = #tpu.core_type<tc>, window_params = [{transform_indices = @transform_0, window_bounds = array<i64: 8, 40>}, {pipeline_mode = #tpu.pipeline_mode<synchronous>, transform_indices = @transform_1, window_bounds = array<i64: 40, 256>}, {pipeline_mode = #tpu.pipeline_mode<synchronous>, transform_indices = @transform_2, window_bounds = array<i64: 1, 256>}, {pipeline_mode = #tpu.pipeline_mode<synchronous>, transform_indices = @transform_3, window_bounds = array<i64: 128, 128>}, {pipeline_mode = #tpu.pipeline_mode<synchronous>, transform_indices = @transform_4, window_bounds = array<i64: 1, 128>}, {pipeline_mode = #tpu.pipeline_mode<synchronous>, transform_indices = @transform_5, window_bounds = array<i64: 128, 256>}, {pipeline_mode = #tpu.pipeline_mode<synchronous>, transform_indices = @transform_6, window_bounds = array<i64: 1, 256>}, {pipeline_mode = #tpu.pipeline_mode<synchronous>, transform_indices = @transform_7, window_bounds = array<i64: 256, 256>}, {pipeline_mode = #tpu.pipeline_mode<synchronous>, transform_indices = @transform_8, window_bounds = array<i64: 1, 256>}, {pipeline_mode = #tpu.pipeline_mode<synchronous>, transform_indices = @transform_9, window_bounds = array<i64: 256, 128>}, {pipeline_mode = #tpu.pipeline_mode<synchronous>, transform_indices = @transform_10, window_bounds = array<i64: 1, 128>}, {transform_indices = @transform_11, window_bounds = array<i64: 8, 128>}]} {
    %c0 = arith.constant 0 : index
    %c0_0 = arith.constant 0 : index
    %0 = vector.load %arg1[%c0, %c0_0] : memref<8x40xbf16, #tpu.memory_space<vmem>>, vector<8x40xbf16>
    %c0_1 = arith.constant 0 : index
    %c0_2 = arith.constant 0 : index
    %1 = vector.load %arg2[%c0_1, %c0_2] : memref<40x256xbf16, #tpu.memory_space<vmem>>, vector<40x256xbf16>
    %cst = arith.constant dense<0.000000e+00> : vector<8x256xf32>
    %2 = tpu.matmul %0, %1, %cst {dimension_numbers = #tpu.dot_dimension_numbers<[1], [0], [0], [1], [0, 0, 1, 1], [], []>} : vector<8x40xbf16>, vector<40x256xbf16>, vector<8x256xf32> -> vector<8x256xf32>
    %c0_3 = arith.constant 0 : index
    %c0_4 = arith.constant 0 : index
    %3 = vector.load %arg3[%c0_3, %c0_4] : memref<1x256xf32, #tpu.memory_space<vmem>>, vector<1x256xf32>
    %4 = vector.broadcast %3 : vector<1x256xf32> to vector<8x256xf32>
    %5 = arith.addf %2, %4 : vector<8x256xf32>
    %cst_5 = arith.constant 0.000000e+00 : f32
    %6 = vector.broadcast %cst_5 : f32 to vector<8x256xf32>
    %7 = arith.maximumf %5, %6 : vector<8x256xf32>
    %8 = vector.extract_strided_slice %7 {offsets = [0, 0], sizes = [8, 128], strides = [1, 1]} : vector<8x256xf32> to vector<8x128xf32>
    %9 = vector.extract_strided_slice %7 {offsets = [0, 128], sizes = [8, 128], strides = [1, 1]} : vector<8x256xf32> to vector<8x128xf32>
    %10 = arith.truncf %9 : vector<8x128xf32> to vector<8x128xbf16>
    %c0_6 = arith.constant 0 : index
    %c0_7 = arith.constant 0 : index
    %11 = vector.load %arg4[%c0_6, %c0_7] : memref<128x128xbf16, #tpu.memory_space<vmem>>, vector<128x128xbf16>
    %cst_8 = arith.constant dense<0.000000e+00> : vector<8x128xf32>
    %12 = tpu.matmul %10, %11, %cst_8 {dimension_numbers = #tpu.dot_dimension_numbers<[1], [0], [0], [1], [0, 0, 1, 1], [], []>} : vector<8x128xbf16>, vector<128x128xbf16>, vector<8x128xf32> -> vector<8x128xf32>
    %c0_9 = arith.constant 0 : index
    %c0_10 = arith.constant 0 : index
    %13 = vector.load %arg5[%c0_9, %c0_10] : memref<1x128xf32, #tpu.memory_space<vmem>>, vector<1x128xf32>
    %14 = vector.broadcast %13 : vector<1x128xf32> to vector<8x128xf32>
    %15 = arith.addf %12, %14 : vector<8x128xf32>
    %cst_11 = arith.constant 0.000000e+00 : f32
    %16 = vector.broadcast %cst_11 : f32 to vector<8x128xf32>
    %17 = arith.maximumf %15, %16 : vector<8x128xf32>
    %18 = arith.addf %8, %17 : vector<8x128xf32>
    %19 = arith.truncf %18 : vector<8x128xf32> to vector<8x128xbf16>
    %c0_12 = arith.constant 0 : index
    %c0_13 = arith.constant 0 : index
    %20 = vector.load %arg6[%c0_12, %c0_13] : memref<128x256xbf16, #tpu.memory_space<vmem>>, vector<128x256xbf16>
    %cst_14 = arith.constant dense<0.000000e+00> : vector<8x256xf32>
    %21 = tpu.matmul %19, %20, %cst_14 {dimension_numbers = #tpu.dot_dimension_numbers<[1], [0], [0], [1], [0, 0, 1, 1], [], []>} : vector<8x128xbf16>, vector<128x256xbf16>, vector<8x256xf32> -> vector<8x256xf32>
    %c0_15 = arith.constant 0 : index
    %c0_16 = arith.constant 0 : index
    %22 = vector.load %arg7[%c0_15, %c0_16] : memref<1x256xf32, #tpu.memory_space<vmem>>, vector<1x256xf32>
    %23 = vector.broadcast %22 : vector<1x256xf32> to vector<8x256xf32>
    %24 = arith.addf %21, %23 : vector<8x256xf32>
    %cst_17 = arith.constant 0.000000e+00 : f32
    %25 = vector.broadcast %cst_17 : f32 to vector<8x256xf32>
    %26 = arith.maximumf %24, %25 : vector<8x256xf32>
    %27 = arith.truncf %26 : vector<8x256xf32> to vector<8x256xbf16>
    %c0_18 = arith.constant 0 : index
    %c0_19 = arith.constant 0 : index
    %28 = vector.load %arg8[%c0_18, %c0_19] : memref<256x256xbf16, #tpu.memory_space<vmem>>, vector<256x256xbf16>
    %cst_20 = arith.constant dense<0.000000e+00> : vector<8x256xf32>
    %29 = tpu.matmul %27, %28, %cst_20 {dimension_numbers = #tpu.dot_dimension_numbers<[1], [0], [0], [1], [0, 0, 1, 1], [], []>} : vector<8x256xbf16>, vector<256x256xbf16>, vector<8x256xf32> -> vector<8x256xf32>
    %c0_21 = arith.constant 0 : index
    %c0_22 = arith.constant 0 : index
    %30 = vector.load %arg9[%c0_21, %c0_22] : memref<1x256xf32, #tpu.memory_space<vmem>>, vector<1x256xf32>
    %31 = vector.broadcast %30 : vector<1x256xf32> to vector<8x256xf32>
    %32 = arith.addf %29, %31 : vector<8x256xf32>
    %cst_23 = arith.constant 0.000000e+00 : f32
    %33 = vector.broadcast %cst_23 : f32 to vector<8x256xf32>
    %34 = arith.maximumf %32, %33 : vector<8x256xf32>
    %35 = arith.truncf %34 : vector<8x256xf32> to vector<8x256xbf16>
    %c0_24 = arith.constant 0 : index
    %c0_25 = arith.constant 0 : index
    %36 = vector.load %arg10[%c0_24, %c0_25] : memref<256x128xbf16, #tpu.memory_space<vmem>>, vector<256x128xbf16>
    %cst_26 = arith.constant dense<0.000000e+00> : vector<8x128xf32>
    %37 = tpu.matmul %35, %36, %cst_26 {dimension_numbers = #tpu.dot_dimension_numbers<[1], [0], [0], [1], [0, 0, 1, 1], [], []>} : vector<8x256xbf16>, vector<256x128xbf16>, vector<8x128xf32> -> vector<8x128xf32>
    %c0_27 = arith.constant 0 : index
    %c0_28 = arith.constant 0 : index
    %38 = vector.load %arg11[%c0_27, %c0_28] : memref<1x128xf32, #tpu.memory_space<vmem>>, vector<1x128xf32>
    %39 = vector.broadcast %38 : vector<1x128xf32> to vector<8x128xf32>
    %40 = arith.addf %37, %39 : vector<8x128xf32>
    %41 = arith.truncf %40 : vector<8x128xf32> to vector<8x128xbf16>
    %c0_29 = arith.constant 0 : index
    %c0_30 = arith.constant 0 : index
    %42 = vector.load %arg12[%c0_29, %c0_30] : memref<8x128xbf16, #tpu.memory_space<vmem>>, vector<8x128xbf16>
    tpu.vector_store %arg12[%c0_29, %c0_30], %41 {strides = array<i32>} : memref<8x128xbf16, #tpu.memory_space<vmem>>, vector<8x128xbf16>,
    return
  }
  func.func @transform_0(%arg0: i32) -> (i32, i32) {
    %c0_i32 = arith.constant 0 : i32
    %c0_i32_0 = arith.constant 0 : i32
    return %arg0, %c0_i32 : i32, i32
  }
  func.func @transform_1(%arg0: i32) -> (i32, i32) {
    %c0_i32 = arith.constant 0 : i32
    %c0_i32_0 = arith.constant 0 : i32
    %c0_i32_1 = arith.constant 0 : i32
    return %c0_i32, %c0_i32_0 : i32, i32
  }
  func.func @transform_2(%arg0: i32) -> (i32, i32) {
    %c0_i32 = arith.constant 0 : i32
    %c0_i32_0 = arith.constant 0 : i32
    %c0_i32_1 = arith.constant 0 : i32
    return %c0_i32, %c0_i32_0 : i32, i32
  }
  func.func @transform_3(%arg0: i32) -> (i32, i32) {
    %c0_i32 = arith.constant 0 : i32
    %c0_i32_0 = arith.constant 0 : i32
    %c0_i32_1 = arith.constant 0 : i32
    return %c0_i32, %c0_i32_0 : i32, i32
  }
  func.func @transform_4(%arg0: i32) -> (i32, i32) {
    %c0_i32 = arith.constant 0 : i32
    %c0_i32_0 = arith.constant 0 : i32
    %c0_i32_1 = arith.constant 0 : i32
    return %c0_i32, %c0_i32_0 : i32, i32
  }
  func.func @transform_5(%arg0: i32) -> (i32, i32) {
    %c0_i32 = arith.constant 0 : i32
    %c0_i32_0 = arith.constant 0 : i32
    %c0_i32_1 = arith.constant 0 : i32
    return %c0_i32, %c0_i32_0 : i32, i32
  }
  func.func @transform_6(%arg0: i32) -> (i32, i32) {
    %c0_i32 = arith.constant 0 : i32
    %c0_i32_0 = arith.constant 0 : i32
    %c0_i32_1 = arith.constant 0 : i32
    return %c0_i32, %c0_i32_0 : i32, i32
  }
  func.func @transform_7(%arg0: i32) -> (i32, i32) {
    %c0_i32 = arith.constant 0 : i32
    %c0_i32_0 = arith.constant 0 : i32
    %c0_i32_1 = arith.constant 0 : i32
    return %c0_i32, %c0_i32_0 : i32, i32
  }
  func.func @transform_8(%arg0: i32) -> (i32, i32) {
    %c0_i32 = arith.constant 0 : i32
    %c0_i32_0 = arith.constant 0 : i32
    %c0_i32_1 = arith.constant 0 : i32
    return %c0_i32, %c0_i32_0 : i32, i32
  }
  func.func @transform_9(%arg0: i32) -> (i32, i32) {
    %c0_i32 = arith.constant 0 : i32
    %c0_i32_0 = arith.constant 0 : i32
    %c0_i32_1 = arith.constant 0 : i32
    return %c0_i32, %c0_i32_0 : i32, i32
  }
  func.func @transform_10(%arg0: i32) -> (i32, i32) {
    %c0_i32 = arith.constant 0 : i32
    %c0_i32_0 = arith.constant 0 : i32
    %c0_i32_1 = arith.constant 0 : i32
    return %c0_i32, %c0_i32_0 : i32, i32
  }
  func.func @transform_11(%arg0: i32) -> (i32, i32) {
    %c0_i32 = arith.constant 0 : i32
    %c0_i32_0 = arith.constant 0 : i32
    return %arg0, %c0_i32 : i32, i32
  }
}

</mosaic_0001>

<bundles_post_ra>
// kernel: improved_dqn_forward.1
= control target key start
LH: loop header
LB: loop body
LE: loop exit
PB: predicated region body
PF: predicated region fallthrough
CT: control target
= control target key end

     0   :  { %16 = vsyncpa [#allocation3], 0  ;;  %s1459_s0 = inlined_call_operand.vmem [shape: bf16[8,40], index: 0, kind: input, shape index: {}]   ;;  %s1460_s1 = inlined_call_operand.hbm [shape: bf16[40,256], index: 1, kind: input, shape index: {}]   ;;  %s1461_s2 = inlined_call_operand.vmem [shape: f32[1,256], index: 2, kind: input, shape index: {}]   ;;  %s1462_s3 = inlined_call_operand.hbm [shape: bf16[128,128], index: 3, kind: input, shape index: {}]   ;;  %s1463_s4 = inlined_call_operand.vmem [shape: f32[1,128], index: 4, kind: input, shape index: {}]   ;;  %s1464_s5 = inlined_call_operand.hbm [shape: bf16[128,256], index: 5, kind: input, shape index: {}]   ;;  %s1465_s6 = inlined_call_operand.vmem [shape: f32[1,256], index: 6, kind: input, shape index: {}]   ;;  %s1466_s7 = inlined_call_operand.hbm [shape: bf16[256,256], index: 7, kind: input, shape index: {}]   ;;  %s1467_s8 = inlined_call_operand.vmem [shape: f32[1,256], index: 8, kind: input, shape index: {}]   ;;  %s1468_s9 = inlined_call_operand.hbm [shape: bf16[256,128], index: 9, kind: input, shape index: {}]   ;;  %s1469_s10 = inlined_call_operand.vmem [shape: f32[1,128], index: 10, kind: input, shape index: {}]   ;;  %s1470_s11 = inlined_call_operand.vmem [shape: bf16[8,128], index: 11, kind: output, shape index: {}]  }
   0x1   :  { %17 = vsyncpa [#allocation5], 0 }
   0x2   :  { %18 = vsyncpa [#allocation8], 0  ;;  %s1270_s17 = smov [#allocation4]   ;;  %s1154_s21 = scalar_lea.hbm %s1462_s3, 1024 }
   0x3   :  { %s40_s18 = sshll.u32 %s1270_s17, 4  ;;  %p1155_p0 = scmp.ne.s32.totalorder %s1462_s3, %s1154_s21  ;;  %s41_s18 = int_to_ptr.vmem [resolvable:$true] %s40_s18 }
   0x4   :  { %p1158_p1 = scmp.lt.u32.totalorder %s1154_s21, %s1462_s3 }
   0x6   :  { %p1160_p2 = pnand %p1158_p1, %p1155_p0 }
   0x8   :  { %1163 = shalt.err (!%p1160_p2)
}
   0x9   :  { %s1164_s26 = scalar_lea.vmem %s41_s18, 1024  ;;  %p1169_p4 = scmp.lt.s32.totalorder %s41_s18, %s41_s18 }
   0xa   :  { %p1165_p3 = scmp.ne.s32.totalorder %s41_s18, %s1164_s26  ;;  %p1170_p5 = scmp.lt.s32.totalorder %s1164_s26, %s1164_s26 }
   0xc   :  { %p1171_p6 = por %p1170_p5, %p1169_p4 }
   0xe   :  { %p1172_p7 = pnand %p1171_p6, %p1165_p3 }
  0x10   :  { %1175 = shalt.err (!%p1172_p7)
}
  0x11   :  { %s1271_s27 = smov 64   ;;  %s1272_s28 = smov 4  }
  0x12   :  { %46 = dma.hbm_to_vmem [thread:$0]  %s1462_s3, 1024, %s41_s18, [#allocation5], %s1271_s27, %s1271_s27, %s1272_s28  }
  0x13   :  { %s1273_s12 = smov [#allocation7]   ;;  %s1274_s14 = smov [#allocation2]  }
  0x14   :  { %s68_s13 = sshll.u32 %s1273_s12, 4  ;;  %s26_s15 = sshll.u32 %s1274_s14, 4  ;;  %s69_s13 = int_to_ptr.vmem [resolvable:$true] %s68_s13  ;;  %s27_s15 = int_to_ptr.vmem [resolvable:$true] %s26_s15 }
  0x15   :  { %s1176_s19 = scalar_lea.hbm %s1466_s7, 4096 }
  0x16   :  { %p1177_p8 = scmp.ne.s32.totalorder %s1466_s7, %s1176_s19  ;;  %p1180_p9 = scmp.lt.u32.totalorder %s1176_s19, %s1466_s7 }
  0x18   :  { %p1182_p10 = pnand %p1180_p9, %p1177_p8 }
  0x1a   :  { %1185 = shalt.err (!%p1182_p10)
}
  0x1b   :  { %s1186_s3 = scalar_lea.vmem %s69_s13, 4096  ;;  %p1191_p12 = scmp.lt.s32.totalorder %s69_s13, %s69_s13 }
  0x1c   :  { %p1187_p11 = scmp.ne.s32.totalorder %s69_s13, %s1186_s3  ;;  %p1192_p13 = scmp.lt.s32.totalorder %s1186_s3, %s1186_s3 }
  0x1e   :  { %p1193_p0 = por %p1192_p13, %p1191_p12 }
  0x20   :  { %p1194_p1 = pnand %p1193_p0, %p1187_p11 }
  0x22   :  { %1197 = shalt.err (!%p1194_p1)
}
  0x23   :  { %s1275_s18 = smov 128   ;;  %s1276_s24 = smov 8  }
  0x24   :  { %74 = dma.hbm_to_vmem [thread:$0]  %s1466_s7, 4096, %s69_s13, [#allocation8], %s1275_s18, %s1275_s18, %s1276_s24  }
  0x25   :  { %s1198_s12 = scalar_lea.hbm %s1460_s1, 640 }
  0x26   :  { %p1199_p2 = scmp.ne.s32.totalorder %s1460_s1, %s1198_s12  ;;  %p1202_p3 = scmp.lt.u32.totalorder %s1198_s12, %s1460_s1 }
  0x28   :  { %p1204_p4 = pnand %p1202_p3, %p1199_p2 }
  0x2a   :  { %1207 = shalt.err (!%p1204_p4)
}
  0x2b   :  { %s1208_s20 = scalar_lea.vmem %s27_s15, 640  ;;  %p1213_p6 = scmp.lt.s32.totalorder %s27_s15, %s27_s15 }
  0x2c   :  { %p1209_p5 = scmp.ne.s32.totalorder %s27_s15, %s1208_s20  ;;  %p1214_p7 = scmp.lt.s32.totalorder %s1208_s20, %s1208_s20 }
  0x2e   :  { %p1215_p8 = por %p1214_p7, %p1213_p6 }
  0x30   :  { %p1216_p9 = pnand %p1215_p8, %p1209_p5 }
  0x32   :  { %1219 = shalt.err (!%p1216_p9)
}
  0x33   :  { %32 = dma.hbm_to_vmem [thread:$0]  %s1460_s1, 640, %s27_s15, [#allocation3], %s1275_s18, %s1275_s18, %s1276_s24  }
  0x34   :  { %s1277_s21 = smov [#allocation6]   ;;  %s1278_s23 = smov [#allocation9]  }
  0x35   :  { %s54_s22 = sshll.u32 %s1277_s21, 4  ;;  %s82_s3 = sshll.u32 %s1278_s23, 4  ;;  %s55_s22 = int_to_ptr.vmem [resolvable:$true] %s54_s22  ;;  %s83_s3 = int_to_ptr.vmem [resolvable:$true] %s82_s3 }
  0x36   :  { %s1220_s29 = scalar_lea.hbm %s1464_s5, 2048 }
  0x37   :  { %p1221_p10 = scmp.ne.s32.totalorder %s1464_s5, %s1220_s29  ;;  %p1224_p11 = scmp.lt.u32.totalorder %s1220_s29, %s1464_s5 }
  0x39   :  { %p1226_p12 = pnand %p1224_p11, %p1221_p10 }
  0x3b   :  { %1229 = shalt.err (!%p1226_p12)
}
  0x3c   :  { %s1230_s1 = scalar_lea.vmem %s55_s22, 2048  ;;  %p1235_p0 = scmp.lt.s32.totalorder %s55_s22, %s55_s22 }
  0x3d   :  { %p1231_p13 = scmp.ne.s32.totalorder %s55_s22, %s1230_s1  ;;  %p1236_p1 = scmp.lt.s32.totalorder %s1230_s1, %s1230_s1 }
  0x3f   :  { %p1237_p2 = por %p1236_p1, %p1235_p0 }
  0x41   :  { %p1238_p3 = pnand %p1237_p2, %p1231_p13 }
  0x43   :  { %1241 = shalt.err (!%p1238_p3)
}
  0x44   :  { %60 = dma.hbm_to_vmem [thread:$0]  %s1464_s5, 2048, %s55_s22, [#allocation5], %s1275_s18, %s1275_s18, %s1276_s24  }
  0x45   :  { %s1242_s7 = scalar_lea.hbm %s1468_s9, 2048 }
  0x46   :  { %p1243_p4 = scmp.ne.s32.totalorder %s1468_s9, %s1242_s7  ;;  %p1246_p5 = scmp.lt.u32.totalorder %s1242_s7, %s1468_s9 }
  0x48   :  { %p1248_p6 = pnand %p1246_p5, %p1243_p4 }
  0x4a   :  { %1251 = shalt.err (!%p1248_p6)
}
  0x4b   :  { %s1252_s26 = scalar_lea.vmem %s83_s3, 2048  ;;  %p1257_p8 = scmp.lt.s32.totalorder %s83_s3, %s83_s3 }
  0x4c   :  { %p1253_p7 = scmp.ne.s32.totalorder %s83_s3, %s1252_s26  ;;  %p1258_p9 = scmp.lt.s32.totalorder %s1252_s26, %s1252_s26 }
  0x4e   :  { %p1259_p10 = por %p1258_p9, %p1257_p8 }
  0x50   :  { %p1260_p11 = pnand %p1259_p10, %p1253_p7 }
  0x52   :  { %1263 = shalt.err (!%p1260_p11)
}
  0x53   :  { %88 = dma.hbm_to_vmem [thread:$0]  %s1468_s9, 2048, %s83_s3, [#allocation8], %s1271_s27, %s1271_s27, %s1272_s28  }
  0x54   :  { %1264 = dma.done.wait [#allocation3], 640  }
  0x55   :  { %1265 = vsyncadd [#allocation3], 4294966656 }
  0x56   :  { %1266 = dma.done.wait [#allocation5], 3072  }
  0x57   :  { %1267 = vsyncadd [#allocation5], 4294964224 }
  0x58   :  { %1268 = dma.done.wait [#allocation8], 6144  }
  0x59   :  { %1269 = vsyncadd [#allocation8], 4294961152  ;;  %v1279_v0 = vmov 0   ;;  %v1280_v1 = vmov 0.0   ;;  %v1050_v2 = vld [vmem:[#allocation2 + $0x4] ss:$8 sps:$4 sm:$0xff]   ;;  %v115_v31 = vlaneseq }
  0x5a   :  { %193 = vmatprep.mubr.bf16.mxu0 %v1279_v0  ;;  %1018 = vmatprep.subr.bf16.mxu1 %v1280_v1  ;;  %v1052_v3 = vld [vmem:[#allocation2] ss:$8 sps:$4 sm:$0xff]   ;;  %v1053_v4 = vld [vmem:[#allocation2 + $0x14] ss:$8 sps:$4 sm:$0xff]   ;;  %v1055_v6 = vld [vmem:[#allocation2 + $0x10] ss:$8 sps:$4 sm:$0xff]  }
  0x5b   :  { %161 = vmatprep.subr.bf16.mxu0 %v1050_v2  ;;  %v112_v5 = vld [vmem:[#allocation2 + $0x20] sm:$0xff]  ;;  %v1058_v9 = vld [vmem:[#allocation4] sm:$0xff]   ;;  %vm154_vm0 = vcmask 1043456   ;;  %v1059_v10 = vld [vmem:[#allocation4 + $0x8] sm:$0xff]   ;;  %vm150_vm1 = vcmask 326656   ;;  %vm1281_vm2 = vmmov 0  }
  0x5c   :  { %162 = vmatpush1.bf16.msra.mxu0 %v1052_v3  ;;  %v910_v7 = vcombine.high %v112_v5, %v112_v5  ;;  %v909_v8 = vcombine.low %v112_v5, %v112_v5  ;;  %1019 = vmatpush3.bf16.msra.mxu1 %v1058_v9  ;;  %v107_v12 = vld [vmem:[%s1459_s0] sm:$0xf]  ;;  %v1060_v13 = vld [vmem:[#allocation4 + $0x10] sm:$0xff]   ;;  %v1062_v15 = vld [vmem:[#allocation4 + $0x20] sm:$0xff]   ;;  %v1420_v32 = vshrl.u32 %v115_v31, 7 }
  0x5d   :  { %163 = vmatprep.subr.bf16.mxu0 %v1053_v4  ;;  %1020 = vmatprep.subr.bf16.mxu1 %v1280_v1  ;;  %v1061_v14 = vld [vmem:[#allocation4 + $0x18] sm:$0xff]   ;;  %v1063_v16 = vld [vmem:[#allocation4 + $0x28] sm:$0xff]   ;;  %v1064_v17 = vld [vmem:[#allocation4 + $0x30] sm:$0xff]  }
  0x5e   :  { %v156_v11 = vsel %vm154_vm0, %v909_v8, 0  ;;  %v1065_v18 = vld [vmem:[#allocation4 + $0x38] sm:$0xff]   ;;  %1034 = vmatprep.mubr.msk.bf16.mxu1 %vm1281_vm2, %v1280_v1  ;;  %v1066_v19 = vld [vmem:[#allocation6] ss:$8 sps:$4 sm:$0xff]   ;;  %v1068_v20 = vld [vmem:[#allocation6 + $0x4] ss:$8 sps:$4 sm:$0xff]  }
  0x5f   :  { %v1071_v21 = vld [vmem:[#allocation6 + $0x14] ss:$8 sps:$4 sm:$0xff]   ;;  %v1069_v22 = vld [vmem:[#allocation6 + $0x10] ss:$8 sps:$4 sm:$0xff]   ;;  %v1074_v23 = vld [vmem:[#allocation6 + $0x24] ss:$8 sps:$4 sm:$0xff]  }
  0x60   :  { %164 = vmatpush1.bf16.msra.mxu0 %v1055_v6  ;;  %1021 = vmatpush3.bf16.msra.mxu1 %v1059_v10  ;;  %v1072_v24 = vld [vmem:[#allocation6 + $0x20] ss:$8 sps:$4 sm:$0xff]   ;;  %v1077_v25 = vld [vmem:[#allocation6 + $0x34] ss:$8 sps:$4 sm:$0xff]   ;;  %v1075_v26 = vld [vmem:[#allocation6 + $0x30] ss:$8 sps:$4 sm:$0xff]  }
  0x61   :  { %911 = vmatprep.subr.msk.bf16.mxu0 %vm154_vm0, %v910_v7  ;;  %1022 = vmatprep.subr.bf16.mxu1 %v1280_v1  ;;  %v1080_v27 = vld [vmem:[#allocation6 + $0x44] ss:$8 sps:$4 sm:$0xff]   ;;  %v1078_v28 = vld [vmem:[#allocation6 + $0x40] ss:$8 sps:$4 sm:$0xff]   ;;  %v1083_v29 = vld [vmem:[#allocation6 + $0x54] ss:$8 sps:$4 sm:$0xff]  }
  0x62   :  { %v1081_v30 = vld [vmem:[#allocation6 + $0x50] ss:$8 sps:$4 sm:$0xff]   ;;  %v1423_v33 = vsub.s32 1, %v1420_v32  ;;  %v1086_v43 = vld [vmem:[#allocation6 + $0x64] ss:$8 sps:$4 sm:$0xff]  }
  0x63   :  { %v1428_v34 = vld [vmem:[%s1461_s2] sm:$0x3]  ;;  %v1084_v44 = vld [vmem:[#allocation6 + $0x60] ss:$8 sps:$4 sm:$0xff]   ;;  %v1089_v45 = vld [vmem:[#allocation6 + $0x74] ss:$8 sps:$4 sm:$0xff]  }
  0x64   :  { %166 = vmatpush1.bf16.msra.mxu0 %v156_v11  ;;  %1023 = vmatpush3.bf16.msra.mxu1 %v1060_v13  ;;  %v122_v35 = vrot.slane %v1428_v34, %v1423_v33  ;;  %v1087_v46 = vld [vmem:[#allocation6 + $0x70] ss:$8 sps:$4 sm:$0xff]   ;;  %v1090_v47 = vld [vmem:[#allocation7] ss:$8 sps:$4 sm:$0xff]   ;;  %v1092_v48 = vld [vmem:[#allocation7 + $0x4] ss:$8 sps:$4 sm:$0xff]  }
  0x65   :  { %1024 = vmatprep.subr.bf16.mxu1 %v1280_v1  ;;  %427 = vmatprep.subr.bf16.mxu0 %v1068_v20  ;;  %v1095_v49 = vld [vmem:[#allocation7 + $0x14] ss:$8 sps:$4 sm:$0xff]   ;;  %v1093_v50 = vld [vmem:[#allocation7 + $0x10] ss:$8 sps:$4 sm:$0xff]   ;;  %v1098_v51 = vld [vmem:[#allocation7 + $0x24] ss:$8 sps:$4 sm:$0xff]  }
  0x66   :  { %v1096_v52 = vld [vmem:[#allocation7 + $0x20] ss:$8 sps:$4 sm:$0xff]   ;;  %v1101_v53 = vld [vmem:[#allocation7 + $0x34] ss:$8 sps:$4 sm:$0xff]   ;;  %v1099_v54 = vld [vmem:[#allocation7 + $0x30] ss:$8 sps:$4 sm:$0xff]  }
  0x67   :  { %912 = vmatmul.mubr.msk.bf16.vlgmr.msra.gmra.mrb[0].mxu0 %vm150_vm1, %v107_v12  ;;  %v1104_v55 = vld [vmem:[#allocation7 + $0x44] ss:$8 sps:$4 sm:$0xff]   ;;  %v1102_v56 = vld [vmem:[#allocation7 + $0x40] ss:$8 sps:$4 sm:$0xff]   ;;  %v1107_v57 = vld [vmem:[#allocation7 + $0x54] ss:$8 sps:$4 sm:$0xff]  }
  0x68   :  { %459 = vmatprep.mubr.bf16.mxu0 %v1279_v0  ;;  %1025 = vmatpush3.bf16.msra.mxu1 %v1061_v14  ;;  %v1105_v58 = vld [vmem:[#allocation7 + $0x50] ss:$8 sps:$4 sm:$0xff]   ;;  %v1110_v59 = vld [vmem:[#allocation7 + $0x64] ss:$8 sps:$4 sm:$0xff]   ;;  %v1108_v60 = vld [vmem:[#allocation7 + $0x60] ss:$8 sps:$4 sm:$0xff]  }
  0x69   :  { %1026 = vmatprep.subr.bf16.mxu1 %v1280_v1  ;;  %428 = vmatpush1.bf16.msra.mxu0 %v1066_v19  ;;  %v1113_v61 = vld [vmem:[#allocation7 + $0x74] ss:$8 sps:$4 sm:$0xff]   ;;  %v1111_v62 = vld [vmem:[#allocation7 + $0x70] ss:$8 sps:$4 sm:$0xff]   ;;  %v1116_v63 = vld [vmem:[#allocation7 + $0x84] ss:$8 sps:$4 sm:$0xff]  }
  0x6a   :  { %429 = vmatprep.subr.bf16.mxu0 %v1071_v21  ;;  %v1114_v0 = vld [vmem:[#allocation7 + $0x80] ss:$8 sps:$4 sm:$0xff]   ;;  %v1117_v2 = vld [vmem:[#allocation7 + $0x90] ss:$8 sps:$4 sm:$0xff]   ;;  %v1122_v3 = vld [vmem:[#allocation7 + $0xa4] ss:$8 sps:$4 sm:$0xff]  }
  0x6b   :  { %v1120_v4 = vld [vmem:[#allocation7 + $0xa0] ss:$8 sps:$4 sm:$0xff]   ;;  %v1125_v5 = vld [vmem:[#allocation7 + $0xb4] ss:$8 sps:$4 sm:$0xff]   ;;  %v1123_v6 = vld [vmem:[#allocation7 + $0xb0] ss:$8 sps:$4 sm:$0xff]  }
  0x6c   :  { %1027 = vmatpush3.bf16.msra.mxu1 %v1062_v15  ;;  %v1128_v7 = vld [vmem:[#allocation7 + $0xc4] ss:$8 sps:$4 sm:$0xff]   ;;  %v1126_v8 = vld [vmem:[#allocation7 + $0xc0] ss:$8 sps:$4 sm:$0xff]   ;;  %v1131_v9 = vld [vmem:[#allocation7 + $0xd4] ss:$8 sps:$4 sm:$0xff]  }
  0x6d   :  { %1028 = vmatprep.subr.bf16.mxu1 %v1280_v1  ;;  %430 = vmatpush1.bf16.msra.mxu0 %v1069_v22  ;;  %v1129_v10 = vld [vmem:[#allocation7 + $0xd0] ss:$8 sps:$4 sm:$0xff]   ;;  %v1435_v11 = vsub.s32 0, %v1420_v32  ;;  %v1141_v31 = vld [vmem:[#allocation9 + $0x8] sm:$0xff]  }
  0x6e   :  { %431 = vmatprep.subr.bf16.mxu0 %v1074_v23  ;;  %v913_v13 = vld [vmem:[%s1463_s4] ss:$0 sm:$0xff]  ;;  %v1142_v32 = vld [vmem:[#allocation9 + $0x50] sm:$0xff]  }
  0x6f   :  { %v118_v12 = vrot.slane %v1428_v34, %v1435_v11  ;;  %v1143_v34 = vld [vmem:[#allocation9 + $0x10] sm:$0xff]  }
  0x70   :  { %1029 = vmatpush3.bf16.msra.mxu1 %v1063_v16 }
  0x71   :  { %1030 = vmatprep.subr.bf16.mxu1 %v1280_v1  ;;  %432 = vmatpush1.bf16.msra.mxu0 %v1072_v24  ;;  %v1134_v24 = vld [vmem:[#allocation7 + $0xe4] ss:$8 sps:$4 sm:$0xff]  }
  0x72   :  { %433 = vmatprep.subr.bf16.mxu0 %v1077_v25  ;;  %v1132_v25 = vld [vmem:[#allocation7 + $0xe0] ss:$8 sps:$4 sm:$0xff]  }
  0x74   :  { %1031 = vmatpush3.bf16.msra.mxu1 %v1064_v17 }
  0x75   :  { %1032 = vmatprep.subr.bf16.mxu1 %v1280_v1  ;;  %434 = vmatpush1.bf16.msra.mxu0 %v1075_v26  ;;  %v1119_v1 = vld [vmem:[#allocation7 + $0x94] ss:$8 sps:$4 sm:$0xff]  }
  0x76   :  { %435 = vmatprep.subr.bf16.mxu0 %v1080_v27  ;;  %v1137_v26 = vld [vmem:[#allocation7 + $0xf4] ss:$8 sps:$4 sm:$0xff]   ;;  %v1135_v27 = vld [vmem:[#allocation7 + $0xf0] ss:$8 sps:$4 sm:$0xff]  }
  0x78   :  { %1033 = vmatpush3.bf16.msra.mxu1 %v1065_v18 }
  0x79   :  { %436 = vmatpush1.bf16.msra.mxu0 %v1078_v28  ;;  %676 = vmatprep.subr.bf16.mxu1 %v1092_v48  ;;  %v1138_v28 = vld [vmem:[#allocation9 + $0x40] sm:$0xff]  }
  0x7a   :  { %437 = vmatprep.subr.bf16.mxu0 %v1083_v29  ;;  %v1139_v29 = vld [vmem:[#allocation9] sm:$0xff]  }
  0x7d   :  { %438 = vmatpush1.bf16.msra.mxu0 %v1081_v30  ;;  %v1140_v30 = vld [vmem:[#allocation9 + $0x48] sm:$0xff]  }
  0x7e   :  { %439 = vmatprep.subr.bf16.mxu0 %v1086_v43 }
  0x81   :  { %440 = vmatpush1.bf16.msra.mxu0 %v1084_v44 }
  0x82   :  { %441 = vmatprep.subr.bf16.mxu0 %v1089_v45 }
  0x85   :  { %442 = vmatpush1.bf16.msra.mxu0 %v1087_v46 }
  0x86   :  { %996 = vmatprep.subr.bf16.mxu0 %v1138_v28 }
 0x13a   :  { %v1432_v36 = vpop.f32.mrb[0].mxu0 }
 0x13b   :  { %v197_v37 = vpop.f32.mrb[1].mxu0  ;;  %v196_v14 = vadd.f32 %v1432_v36, %v118_v12  ;;  %v1145_v36 = vld [vmem:[#allocation9 + $0x18] sm:$0xff]  }
 0x13c   :  { %v198_v38 = vadd.f32 %v197_v37, %v122_v35  ;;  %v199_v39 = vpop.f32.mrb[2].mxu0  ;;  %v1144_v35 = vld [vmem:[#allocation9 + $0x58] sm:$0xff]   ;;  %v1146_v37 = vld [vmem:[#allocation9 + $0x60] sm:$0xff]  }
 0x13d   :  { %v200_v40 = vpop.f32.mrb[3].mxu0  ;;  %v202_v19 = vmax.f32 %v196_v14, 0.0  ;;  %v1148_v39 = vld [vmem:[#allocation9 + $0x68] sm:$0xff]  }
 0x13e   :  { %v203_v41 = vmax.f32 %v198_v38, 0.0  ;;  %v1147_v38 = vld [vmem:[#allocation9 + $0x20] sm:$0xff]   ;;  %v1149_v40 = vld [vmem:[#allocation9 + $0x28] sm:$0xff]  }
 0x140   :  { %v204_v42 = vpack.c.bf16 %v203_v41, %v203_v41  ;;  %v335_v41 = vld [vmem:[%s1465_s6] sm:$0x3] }
 0x141   :  { %v344_v43 = vrot.slane %v335_v41, %v1423_v33 }
 0x142   :  { %1035 = vmatmul.mubr.bf16.vlgmr.msra.gmra.mrb[0].mxu1 %v204_v42  ;;  %v340_v42 = vrot.slane %v335_v41, %v1435_v11 }
 0x143   :  { %677 = vmatpush1.bf16.msra.mxu1 %v1090_v47 }
 0x144   :  { %678 = vmatprep.subr.bf16.mxu1 %v1095_v49 }
 0x147   :  { %679 = vmatpush1.bf16.msra.mxu1 %v1093_v50 }
 0x148   :  { %680 = vmatprep.subr.bf16.mxu1 %v1098_v51 }
 0x14b   :  { %681 = vmatpush1.bf16.msra.mxu1 %v1096_v52 }
 0x14c   :  { %682 = vmatprep.subr.bf16.mxu1 %v1101_v53 }
 0x14f   :  { %683 = vmatpush1.bf16.msra.mxu1 %v1099_v54  ;;  %v1150_v54 = vld [vmem:[#allocation9 + $0x70] sm:$0xff]  }
 0x150   :  { %684 = vmatprep.subr.bf16.mxu1 %v1104_v55  ;;  %v1151_v55 = vld [vmem:[#allocation9 + $0x30] sm:$0xff]  }
 0x153   :  { %685 = vmatpush1.bf16.msra.mxu1 %v1102_v56  ;;  %v1152_v56 = vld [vmem:[#allocation9 + $0x78] sm:$0xff]  }
 0x154   :  { %686 = vmatprep.subr.bf16.mxu1 %v1107_v57  ;;  %v1153_v57 = vld [vmem:[#allocation9 + $0x38] sm:$0xff]  }
 0x157   :  { %687 = vmatpush1.bf16.msra.mxu1 %v1105_v58  ;;  %v504_v58 = vld [vmem:[%s1467_s8] sm:$0x3] }
 0x158   :  { %688 = vmatprep.subr.bf16.mxu1 %v1110_v59  ;;  %v509_v59 = vrot.slane %v504_v58, %v1435_v11 }
 0x15b   :  { %689 = vmatpush1.bf16.msra.mxu1 %v1108_v60  ;;  %v513_v60 = vrot.slane %v504_v58, %v1423_v33 }
 0x15c   :  { %690 = vmatprep.subr.bf16.mxu1 %v1113_v61 }
 0x15f   :  { %691 = vmatpush1.bf16.msra.mxu1 %v1111_v62 }
 0x160   :  { %692 = vmatprep.subr.bf16.mxu1 %v1116_v63 }
 0x163   :  { %693 = vmatpush1.bf16.msra.mxu1 %v1114_v0 }
 0x164   :  { %694 = vmatprep.subr.bf16.mxu1 %v1119_v1 }
 0x167   :  { %695 = vmatpush1.bf16.msra.mxu1 %v1117_v2 }
 0x168   :  { %696 = vmatprep.subr.bf16.mxu1 %v1122_v3 }
 0x16b   :  { %697 = vmatpush1.bf16.msra.mxu1 %v1120_v4 }
 0x16c   :  { %698 = vmatprep.subr.bf16.mxu1 %v1125_v5 }
 0x16f   :  { %699 = vmatpush1.bf16.msra.mxu1 %v1123_v6 }
 0x170   :  { %700 = vmatprep.subr.bf16.mxu1 %v1128_v7 }
 0x173   :  { %701 = vmatpush1.bf16.msra.mxu1 %v1126_v8  ;;  %v970_v8 = vld [vmem:[%s1469_s10] ss:$0 sm:$0xff] }
 0x174   :  { %702 = vmatprep.subr.bf16.mxu1 %v1131_v9 }
 0x177   :  { %703 = vmatpush1.bf16.msra.mxu1 %v1129_v10 }
 0x178   :  { %704 = vmatprep.subr.bf16.mxu1 %v1134_v24 }
 0x17b   :  { %705 = vmatpush1.bf16.msra.mxu1 %v1132_v25 }
 0x17c   :  { %706 = vmatprep.subr.bf16.mxu1 %v1137_v26 }
 0x17f   :  { %707 = vmatpush1.bf16.msra.mxu1 %v1135_v27 }
 0x215   :  { %v310_v15 = vpop.f32.mrb[0].mxu1 }
 0x216   :  { %v311_v16 = vadd.f32 %v913_v13, %v310_v15  ;;  %v1036_v17 = vpop.f32.mrb[1].mxu1 }
 0x217   :  { %v313_v18 = vpop.f32.mrb[2].mxu1 }
 0x218   :  { %v316_v20 = vmax.f32 %v311_v16, 0.0  ;;  %v1037_v21 = vpop.f32.mrb[3].mxu1 }
 0x21a   :  { %v317_v22 = vadd.f32 %v316_v20, %v202_v19 }
 0x21c   :  { %v318_v23 = vpack.c.bf16 %v317_v22, %v317_v22 }
 0x21e   :  { %460 = vmatmul.mubr.bf16.vlgmr.msra.gmra.mrb[4].mxu0 %v318_v23 }
 0x21f   :  { %997 = vmatpush3.bf16.msra.mxu0 %v1139_v29 }
 0x220   :  { %998 = vmatprep.subr.bf16.mxu0 %v1140_v30 }
 0x223   :  { %999 = vmatpush3.bf16.msra.mxu0 %v1141_v31 }
 0x224   :  { %1000 = vmatprep.subr.bf16.mxu0 %v1142_v32 }
 0x227   :  { %1001 = vmatpush3.bf16.msra.mxu0 %v1143_v34 }
 0x228   :  { %1002 = vmatprep.subr.bf16.mxu0 %v1144_v35 }
 0x22b   :  { %1003 = vmatpush3.bf16.msra.mxu0 %v1145_v36 }
 0x22c   :  { %1004 = vmatprep.subr.bf16.mxu0 %v1146_v37 }
 0x22f   :  { %1005 = vmatpush3.bf16.msra.mxu0 %v1147_v38 }
 0x230   :  { %1006 = vmatprep.subr.bf16.mxu0 %v1148_v39 }
 0x233   :  { %1007 = vmatpush3.bf16.msra.mxu0 %v1149_v40 }
 0x234   :  { %1008 = vmatprep.subr.bf16.mxu0 %v1150_v54 }
 0x237   :  { %1009 = vmatpush3.bf16.msra.mxu0 %v1151_v55 }
 0x238   :  { %1010 = vmatprep.subr.bf16.mxu0 %v1152_v56 }
 0x23b   :  { %1011 = vmatpush3.bf16.msra.mxu0 %v1153_v57 }
 0x2f1   :  { %v461_v44 = vpop.f32.mrb[4].mxu0 }
 0x2f2   :  { %v462_v45 = vadd.f32 %v461_v44, %v340_v42  ;;  %v463_v46 = vpop.f32.mrb[5].mxu0 }
 0x2f3   :  { %v464_v47 = vadd.f32 %v463_v46, %v344_v43  ;;  %v465_v48 = vpop.f32.mrb[6].mxu0 }
 0x2f4   :  { %v468_v49 = vmax.f32 %v462_v45, 0.0  ;;  %v466_v50 = vpop.f32.mrb[7].mxu0 }
 0x2f5   :  { %v469_v51 = vmax.f32 %v464_v47, 0.0 }
 0x2f6   :  { %v470_v53 = vpack.c.bf16 %v468_v49, %v468_v49 }
 0x2f7   :  { %v471_v52 = vpack.c.bf16 %v469_v51, %v469_v51 }
 0x2f9   :  { %708 = vmatprep.mubr.bf16.mxu1 %v471_v52 }
 0x2fa   :  { %709 = vmatmul.mubr.bf16.vlgmr.msra.gmra.mrb[4].mxu1 %v470_v53 }
 0x3cd   :  { %v710_v61 = vpop.f32.mrb[4].mxu1 }
 0x3ce   :  { %v711_v62 = vadd.f32 %v710_v61, %v509_v59  ;;  %v712_v63 = vpop.f32.mrb[5].mxu1 }
 0x3cf   :  { %v713_v0 = vadd.f32 %v712_v63, %v513_v60  ;;  %v714_v1 = vpop.f32.mrb[6].mxu1 }
 0x3d0   :  { %v717_v2 = vmax.f32 %v711_v62, 0.0  ;;  %v715_v3 = vpop.f32.mrb[7].mxu1 }
 0x3d1   :  { %v718_v4 = vmax.f32 %v713_v0, 0.0 }
 0x3d2   :  { %v719_v6 = vpack.c.bf16 %v717_v2, %v717_v2 }
 0x3d3   :  { %v720_v5 = vpack.c.bf16 %v718_v4, %v718_v4 }
 0x3d5   :  { %888 = vmatprep.mubr.bf16.mxu0 %v720_v5 }
 0x3d6   :  { %889 = vmatmul.mubr.bf16.vlgmr.msra.gmra.mrb[8].mxu0 %v719_v6 }
 0x4a9   :  { %v1012_v7 = vpop.f32.mrb[8].mxu0 }
 0x4aa   :  { %v1013_v9 = vpop.f32.mrb[9].mxu0 }
 0x4ab   :  { %v1014_v10 = vadd.f32 %v1013_v9, %v1012_v7  ;;  %v1015_v33 = vpop.f32.mrb[10].mxu0 }
 0x4ac   :  { %v1016_v11 = vpop.f32.mrb[11].mxu0 }
 0x4ad   :  { %v891_v12 = vadd.f32 %v1014_v10, %v970_v8 }
 0x4af   :  { %v896_v13 = vpack.c.bf16 %v891_v12, %v891_v12 }
 0x4b1   :  { %897 = vst [vmem:[%s1470_s11] sm:$0xf] %v896_v13 }
 0x4b2   :  { %902 = vsyncpa [#allocation3], 1 }
 0x4b3   :  { %903 = vsyncpa [#allocation5], 1 }
 0x4b4   :  { %904 = vsyncpa [#allocation8], 1 }

</bundles_post_ra>
